<compile_context>
chip_gen: v5e
topology: v5e:2x2
jax: 0.10.0
libtpu: 0.0.40
codegen_flags: <defaults>
</compile_context>

<pallas_src>
import jax
import jax.numpy as jnp
from jax import lax
from jax.experimental import pallas as pl
from jax.experimental.pallas import tpu as pltpu


def _selfcon_loss_kernel(lam_ref, zi_ref, zj_ref, w_ref, o_ref):
    # Keep explicit f32 math: robust if callers hand us bf16 (v5e VPU/EUP has
    # no bf16), and the arrays are tiny so the cast is free.
    zi = zi_ref[...].astype(jnp.float32)          # (n, r)
    zj = zj_ref[...].astype(jnp.float32)          # (n, r)
    w = w_ref[...].astype(jnp.float32)            # (r, d)
    lam = lam_ref[0, 0]
    n = zi.shape[0]

    # Positive-pair term: sum_i 2 * <z_i[i], z_j[i]>
    cross = 2.0 * jnp.sum(zi * zj)

    # Closed-form off-diagonal Gram sums (see header): with z = z_i + z_j,
    #   neg = offdiag(S_ii) + 2*offdiag(S_ij) + offdiag(S_jj)
    #       = ||colsum(z)||^2 - sum(z*z)
    z = zi + zj
    col = jnp.sum(z, axis=0, keepdims=True)       # (1, r) column sums
    neg = jnp.sum(col * col) - jnp.sum(z * z)

    raw = cross - neg / (2.0 * n - 2.0)
    loss = -raw / (2.0 * n)

    # Regularizer: lam/2 * Frobenius norm of elementwise-square of W @ W.T.
    # Contract the feature dim of both operands (== W @ W.T, no transpose op).
    nt = (((1,), (1,)), ((), ()))
    g = lax.dot_general(w, w, nt, preferred_element_type=jnp.float32)  # (r, r)
    g2 = g * g
    reg = 0.5 * lam * jnp.sqrt(jnp.sum(g2 * g2))

    o_ref[0, 0] = loss + reg


def selfcon_loss(z_i, z_j, weight, lam):
    """z_i, z_j: (n, r) embeddings; weight: (r, d) nn.Linear.weight; lam scalar.

    Returns the scalar SelfconLoss value (same semantics as the PyTorch module).
    """
    n, r = z_i.shape
    assert z_j.shape == (n, r), "z_i / z_j shape mismatch"
    assert n >= 2, "SelfconLoss needs n >= 2 (divides by 2n - 2)"
    r_w, d = weight.shape
    assert r_w == r, "projection width mismatch"

    # lam as a runtime SMEM scalar: distinct lam values do NOT recompile.
    lam_arr = jnp.full((1, 1), lam, dtype=jnp.float32)

    # Post-rewrite cost: one r x r x d matmul + O(n*r) elementwise reductions.
    flops = 2 * r * r * d + 3 * r * r + 10 * n * r
    bytes_accessed = 4 * (2 * n * r + r * d + 2)

    out = pl.pallas_call(
        _selfcon_loss_kernel,
        out_shape=jax.ShapeDtypeStruct((1, 1), jnp.float32),
        in_specs=[
            pl.BlockSpec(memory_space=pltpu.MemorySpace.SMEM),   # lam scalar
            pl.BlockSpec(memory_space=pltpu.MemorySpace.VMEM),   # z_i
            pl.BlockSpec(memory_space=pltpu.MemorySpace.VMEM),   # z_j
            pl.BlockSpec(memory_space=pltpu.MemorySpace.VMEM),   # weight
        ],
        out_specs=pl.BlockSpec(memory_space=pltpu.MemorySpace.SMEM),
        cost_estimate=pl.CostEstimate(
            flops=flops, transcendentals=1, bytes_accessed=bytes_accessed),
    )(lam_arr, z_i, z_j, weight)
    return out[0, 0]
    # TODO(synk): for very large n, add a grid over the row axis marked
    # "parallel" and accumulate the partial colsum / sum(z*z) / sum(zi*zj)
    # reductions (VMEM stays O(n_block * r) thanks to the closed-form rewrite,
    # so no (n, n) Gram tiling is ever needed, even on v7x's 64 MiB VMEM).


if __name__ == "__main__":
    # Small shapes consistent with the module: n=8 pairs, r=16 projection dim,
    # d=32 encoder features (weight is the (r, d) nn.Linear weight).
    n, r, d = 8, 16, 32
    lam = 0.1

    key = jax.random.PRNGKey(0)
    k1, k2, k3 = jax.random.split(key, 3)
    z_i = jax.random.normal(k1, (n, r), dtype=jnp.float32)
    z_j = jax.random.normal(k2, (n, r), dtype=jnp.float32)
    bound = 1.0 / (d ** 0.5)
    weight = jax.random.uniform(k3, (r, d), dtype=jnp.float32,
                                minval=-bound, maxval=bound)

    loss = jax.block_until_ready(selfcon_loss(z_i, z_j, weight, lam))

    # Pure-JAX reference mirroring the PyTorch loop exactly.
    ref = 0.0
    denom = 2 * n - 2
    for idx in range(n):
        d_i, d_j = z_i[idx], z_j[idx]
        ref += 2.0 * jnp.dot(d_i, d_j)
        mask = jnp.ones((n,), jnp.float32).at[idx].set(0.0)
        ref -= jnp.dot(z_i @ d_i, mask) / denom
        ref -= jnp.dot(z_i @ d_j, mask) / denom
        ref -= jnp.dot(z_j @ d_i, mask) / denom
        ref -= jnp.dot(z_j @ d_j, mask) / denom
    ref = -ref / (2 * n)
    g = weight @ weight.T
    ref = ref + lam / 2.0 * jnp.sqrt(jnp.sum(jnp.square(jnp.square(g))))

    assert loss.shape == ()
    assert jnp.allclose(loss, ref, atol=1e-4, rtol=1e-4), (loss, ref)
    print("KERNEL_OK")
</pallas_src>

<mosaic_0001>
module attributes {stable_mosaic.version = 11 : i64} {
  func.func @_selfcon_loss_kernel(%arg0: memref<1x1xf32, #tpu.memory_space<smem>>, %arg1: memref<8x16xf32, #tpu.memory_space<vmem>>, %arg2: memref<8x16xf32, #tpu.memory_space<vmem>>, %arg3: memref<16x32xf32, #tpu.memory_space<vmem>>, %arg4: memref<1x1xf32, #tpu.memory_space<smem>>) attributes {dimension_semantics = [], scalar_prefetch = 0 : i64, scratch_operands = 0 : i64, tpu.core_type = #tpu.core_type<tc>} {
    %c0 = arith.constant 0 : index
    %c0_0 = arith.constant 0 : index
    %0 = vector.load %arg1[%c0, %c0_0] : memref<8x16xf32, #tpu.memory_space<vmem>>, vector<8x16xf32>
    %c0_1 = arith.constant 0 : index
    %c0_2 = arith.constant 0 : index
    %1 = vector.load %arg2[%c0_1, %c0_2] : memref<8x16xf32, #tpu.memory_space<vmem>>, vector<8x16xf32>
    %c0_3 = arith.constant 0 : index
    %c0_4 = arith.constant 0 : index
    %2 = vector.load %arg3[%c0_3, %c0_4] : memref<16x32xf32, #tpu.memory_space<vmem>>, vector<16x32xf32>
    %c0_5 = arith.constant 0 : index
    %c0_6 = arith.constant 0 : index
    %3 = memref.load %arg0[%c0_5, %c0_6] : memref<1x1xf32, #tpu.memory_space<smem>>
    %4 = arith.mulf %0, %1 : vector<8x16xf32>
    %5 = vector.shape_cast %4 : vector<8x16xf32> to vector<1x8x16xf32>
    %cst = arith.constant dense<0.000000e+00> : vector<1xf32>
    %6 = vector.multi_reduction <add>, %5, %cst [1, 2] : vector<1x8x16xf32> to vector<1xf32>
    %7 = vector.shape_cast %6 : vector<1xf32> to vector<1x1x1xf32>
    %8 = vector.extract %7[0, 0, 0] : f32 from vector<1x1x1xf32>
    %cst_7 = arith.constant 2.000000e+00 : f32
    %9 = arith.mulf %cst_7, %8 : f32
    %10 = arith.addf %0, %1 : vector<8x16xf32>
    %cst_8 = arith.constant dense<0.000000e+00> : vector<16xf32>
    %11 = vector.multi_reduction <add>, %10, %cst_8 [0] : vector<8x16xf32> to vector<16xf32>
    %12 = vector.shape_cast %11 : vector<16xf32> to vector<1x16xf32>
    %13 = arith.mulf %12, %12 : vector<1x16xf32>
    %14 = vector.shape_cast %13 : vector<1x16xf32> to vector<1x1x16xf32>
    %cst_9 = arith.constant dense<0.000000e+00> : vector<1xf32>
    %15 = vector.multi_reduction <add>, %14, %cst_9 [1, 2] : vector<1x1x16xf32> to vector<1xf32>
    %16 = vector.shape_cast %15 : vector<1xf32> to vector<1x1x1xf32>
    %17 = vector.extract %16[0, 0, 0] : f32 from vector<1x1x1xf32>
    %18 = arith.mulf %10, %10 : vector<8x16xf32>
    %19 = vector.shape_cast %18 : vector<8x16xf32> to vector<1x8x16xf32>
    %cst_10 = arith.constant dense<0.000000e+00> : vector<1xf32>
    %20 = vector.multi_reduction <add>, %19, %cst_10 [1, 2] : vector<1x8x16xf32> to vector<1xf32>
    %21 = vector.shape_cast %20 : vector<1xf32> to vector<1x1x1xf32>
    %22 = vector.extract %21[0, 0, 0] : f32 from vector<1x1x1xf32>
    %23 = arith.subf %17, %22 : f32
    %cst_11 = arith.constant 1.400000e+01 : f32
    %24 = arith.divf %23, %cst_11 : f32
    %25 = arith.subf %9, %24 : f32
    %cst_12 = arith.constant 0.000000e+00 : f32
    %26 = arith.subf %cst_12, %25 : f32
    %cst_13 = arith.constant 1.600000e+01 : f32
    %27 = arith.divf %26, %cst_13 : f32
    %cst_14 = arith.constant dense<0.000000e+00> : vector<16x16xf32>
    %28 = tpu.matmul %2, %2, %cst_14 {dimension_numbers = #tpu.dot_dimension_numbers<[1], [1], [0], [0], [0, 0, 1, 0], [], []>} : vector<16x32xf32>, vector<16x32xf32>, vector<16x16xf32> -> vector<16x16xf32>
    %29 = arith.mulf %28, %28 : vector<16x16xf32>
    %cst_15 = arith.constant 5.000000e-01 : f32
    %30 = arith.mulf %cst_15, %3 : f32
    %31 = arith.mulf %29, %29 : vector<16x16xf32>
    %32 = vector.shape_cast %31 : vector<16x16xf32> to vector<1x16x16xf32>
    %cst_16 = arith.constant dense<0.000000e+00> : vector<1xf32>
    %33 = vector.multi_reduction <add>, %32, %cst_16 [1, 2] : vector<1x16x16xf32> to vector<1xf32>
    %34 = vector.shape_cast %33 : vector<1xf32> to vector<1x1x1xf32>
    %35 = vector.extract %34[0, 0, 0] : f32 from vector<1x1x1xf32>
    %36 = math.sqrt %35 : f32
    %37 = arith.mulf %30, %36 : f32
    %38 = arith.addf %27, %37 : f32
    %c0_17 = arith.constant 0 : index
    %c0_18 = arith.constant 0 : index
    %39 = memref.load %arg4[%c0_17, %c0_18] : memref<1x1xf32, #tpu.memory_space<smem>>
    memref.store %38, %arg4[%c0_17, %c0_18] : memref<1x1xf32, #tpu.memory_space<smem>>
    return
  }
}

</mosaic_0001>

<bundles_post_ra>
// kernel: tpu_custom_call.1
= control target key start
LH: loop header
LB: loop body
LE: loop exit
PB: predicated region body
PF: predicated region fallthrough
CT: control target
= control target key end

     0   :  { %10 = vsyncpa [#allocation4], 0  ;;  %s397_s0 = inlined_call_operand.<no memory space> [shape: f32[1,1], index: 0, kind: input, shape index: {}]   ;;  %s398_s1 = inlined_call_operand.hbm [shape: f32[8,16], index: 1, kind: input, shape index: {}]   ;;  %s399_s2 = inlined_call_operand.hbm [shape: f32[8,16], index: 2, kind: input, shape index: {}]   ;;  %s400_s3 = inlined_call_operand.hbm [shape: f32[16,32], index: 3, kind: input, shape index: {}]   ;;  %s401_s4 = inlined_call_operand.hbm [shape: f32[1,1], index: 4, kind: output, shape index: {}]  }
   0x1   :  { %11 = vsyncpa [#allocation7], 0  ;;  %s31_s17 = sshll.u32 %s399_s2, 4  ;;  %s32_s17 = int_to_ptr.hbm [resolvable:$true] %s31_s17 }
   0x2   :  { %12 = vsyncpa [#allocation5], 0  ;;  %s338_s18 = smov [#allocation6]   ;;  %s20_s22 = sshll.u32 %s398_s1, 4  ;;  %s21_s22 = int_to_ptr.hbm [resolvable:$true] %s20_s22 }
   0x3   :  { %s33_s19 = sshll.u32 %s338_s18, 4  ;;  %s339_s23 = smov [#allocation3]   ;;  %s34_s19 = int_to_ptr.vmem [resolvable:$true] %s33_s19 }
   0x4   :  { %36 = dma.hbm_to_vmem [thread:$0]  %s32_s17, 128, %s34_s19, [#allocation7]  }
   0x5   :  { %s22_s24 = sshll.u32 %s339_s23, 4  ;;  %s41_s27 = sshll.u32 %s400_s3, 4  ;;  %s23_s24 = int_to_ptr.vmem [resolvable:$true] %s22_s24  ;;  %s42_s27 = int_to_ptr.hbm [resolvable:$true] %s41_s27 }
   0x6   :  { %25 = dma.hbm_to_vmem [thread:$0]  %s21_s22, 128, %s23_s24, [#allocation4]  }
   0x7   :  { %s340_s2 = smov [#allocation8]   ;;  %s341_s29 = smov 128  }
   0x8   :  { %s43_s28 = sshll.u32 %s340_s2, 4  ;;  %s342_s30 = smov 8   ;;  %s44_s28 = int_to_ptr.vmem [resolvable:$true] %s43_s28 }
   0x9   :  { %49 = dma.hbm_to_vmem [thread:$0]  %s42_s27, 256, %s44_s28, [#allocation7], %s341_s29, %s341_s29, %s342_s30  }
   0xa   :  { %332 = dma.done.wait [#allocation4], 128  }
   0xb   :  { %333 = vsyncadd [#allocation4], 4294967168 }
   0xc   :  { %334 = dma.done.wait [#allocation7], 384  }
   0xd   :  { %335 = vsyncadd [#allocation7], 4294966912  ;;  %vm132_vm0 = vcmask 261120   ;;  %v65_v0 = vld [vmem:[#allocation8 + $0x8] sm:$0xff]  ;;  %v62_v1 = vld [vmem:[#allocation3] sm:$0xff]  ;;  %vm68_vm1 = vcmask 130048  }
   0xe   :  { %214 = vmatpush.xpose.msk.msra.mxu0 %vm132_vm0, %v65_v0  ;;  %218 = vmatpush.xpose.msk.msra.mxu1 %vm132_vm0, %v65_v0  ;;  %v63_v2 = vld [vmem:[#allocation6] sm:$0xff]  ;;  %v64_v3 = vld [vmem:[#allocation8] sm:$0xff]  ;;  %vm89_vm2 = vcmask 122880   ;;  %v343_v21 = vmov 14.0   ;;  %v344_v55 = vmov 16.0   ;;  %s164_s17 = smul.f32 0.5, %s397_s0 }
   0xf   :  { %v67_v4 = vmul.f32 %v63_v2, %v62_v1  ;;  %v80_v5 = vadd.f32 %v63_v2, %v62_v1  ;;  %242 = vrcp.f32 %v343_v21  ;;  %s202_s20 = sshll.u32 %s401_s4, 4  ;;  %s345_s24 = smov [#allocation9]   ;;  %s203_s20 = int_to_ptr.hbm [resolvable:$true] %s202_s20 }
  0x10   :  { %244 = vrcp.f32 %v344_v55 }
  0x11   :  { %v69_v6 = vsel %vm68_vm1, %v67_v4, 0.0  ;;  %v100_v7 = vmul.f32 %v80_v5, %v80_v5  ;;  %v81_v8 = vsel %vm68_vm1, %v80_v5, 0.0 }
  0x12   :  { %215 = vmatpush.xpose.msk.msra.mxu0 %vm132_vm0, %v64_v3  ;;  %219 = vmatpush.xpose.msk.msra.mxu1 %vm132_vm0, %v64_v3  ;;  %v82_v9 = vrot.slane %v81_v8, 4 }
  0x13   :  { %70 = vadd.xlane.f32.xlu0 %v69_v6  ;;  %v101_v10 = vsel %vm68_vm1, %v100_v7, 0.0 }
  0x14   :  { %102 = vadd.xlane.f32.xlu1 %v101_v10  ;;  %v83_v11 = vadd.f32 %v82_v9, %v81_v8 }
  0x15   :  { %216 = vmatmul.msk.f32.vlgmr.msra.gmra.mxu0 %vm132_vm0, %v64_v3  ;;  %217 = vmatmul.msk.f32.vlgmr.msra.gmra.mxu1 %vm132_vm0, %v65_v0  ;;  %v243_v25 = vpop.eup %242 }
  0x16   :  { %v84_v12 = vrot.slane %v83_v11, 2  ;;  %v113_v29 = vmul.f32 14.0, %v243_v25  ;;  %vm117_vm3 = vweird.f32 %v243_v25  ;;  %v245_v56 = vpop.eup %244 }
  0x17   :  { %v124_v57 = vmul.f32 16.0, %v245_v56  ;;  %vm128_vm4 = vweird.f32 %v245_v56 }
  0x18   :  { %v85_v13 = vadd.f32 %v84_v12, %v83_v11  ;;  %v114_v37 = vsub.f32 1.0, %v113_v29 }
  0x19   :  { %v125_v58 = vsub.f32 1.0, %v124_v57 }
  0x1a   :  { %v86_v14 = vrot.slane %v85_v13, 1  ;;  %v115_v46 = vmul.f32 %v243_v25, %v114_v37 }
  0x1b   :  { %v126_v59 = vmul.f32 %v245_v56, %v125_v58 }
  0x1c   :  { %v87_v15 = vadd.f32 %v86_v14, %v85_v13  ;;  %v116_v50 = vadd.f32 %v243_v25, %v115_v46 }
  0x1d   :  { %v127_v60 = vadd.f32 %v245_v56, %v126_v59 }
  0x1e   :  { %v88_v16 = vmul.f32 %v87_v15, %v87_v15  ;;  %v118_v54 = vsel %vm117_vm3, %v243_v25, %v116_v50 }
  0x1f   :  { %v129_v61 = vsel %vm128_vm4, %v245_v56, %v127_v60 }
  0x20   :  { %v90_v17 = vsel %vm89_vm2, %v88_v16, 0.0 }
  0x21   :  { %91 = vadd.xlane.f32.xlu0 %v90_v17 }
  0x86   :  { %v71_v18 = vpop.xlane.xlu0 %70 }
  0x87   :  { %v72_v19 = vrot.slane %v71_v18, 4  ;;  %v103_v20 = vpop.xlane.xlu1 %102 }
  0x88   :  { %v104_v23 = vrot.slane %v103_v20, 4 }
  0x89   :  { %v73_v22 = vadd.f32 %v72_v19, %v71_v18 }
  0x8a   :  { %v105_v27 = vadd.f32 %v104_v23, %v103_v20 }
  0x8b   :  { %v74_v24 = vrot.slane %v73_v22, 2 }
  0x8c   :  { %v106_v33 = vrot.slane %v105_v27, 2 }
  0x8d   :  { %v75_v26 = vadd.f32 %v74_v24, %v73_v22 }
  0x8e   :  { %v107_v41 = vadd.f32 %v106_v33, %v105_v27 }
  0x8f   :  { %v76_v28 = vrot.slane %v75_v26, 1 }
  0x90   :  { %v108_v48 = vrot.slane %v107_v41, 1 }
  0x91   :  { %v77_v30 = vadd.f32 %v76_v28, %v75_v26 }
  0x92   :  { %v156_v31 = vpop.f32.mrf.mxu0  ;;  %v159_v32 = vpop.f32.mrf.mxu1  ;;  %v109_v52 = vadd.f32 %v108_v48, %v107_v41 }
  0x93   :  { %v162_v34 = vmul.f32 %v156_v31, %v156_v31  ;;  %v163_v35 = vmul.f32 %v159_v32, %v159_v32  ;;  %220 = vpush %v77_v30 }
  0x94   :  { %v92_v36 = vpop.xlane.xlu0 %91 }
  0x95   :  { %v165_v38 = vmul.f32 %v162_v34, %v162_v34  ;;  %v166_v39 = vmul.f32 %v163_v35, %v163_v35  ;;  %v93_v40 = vrot.slane %v92_v36, 4 }
  0x97   :  { %v167_v42 = vsel %vm68_vm1, %v165_v38, 0.0  ;;  %v168_v43 = vsel %vm68_vm1, %v166_v39, 0.0  ;;  %v94_v44 = vadd.f32 %v93_v40, %v92_v36 }
  0x98   :  { %v169_v45 = vadd.f32 %v168_v43, %v167_v42 }
  0x99   :  { %v95_v47 = vrot.slane %v94_v44, 2 }
  0x9a   :  { %170 = vadd.xlane.f32.xlu1 %v169_v45 }
  0x9b   :  { %v96_v49 = vadd.f32 %v95_v47, %v94_v44 }
  0x9d   :  { %v97_v51 = vrot.slane %v96_v49, 1 }
  0x9f   :  { %v98_v53 = vadd.f32 %v97_v51, %v96_v49 }
  0xa1   :  { %222 = vpush %v98_v53 }
  0xa2   :  { %224 = vpush %v109_v52 }
  0xa3   :  { %226 = vpush %v118_v54 }
  0xa4   :  { %228 = vpush %v129_v61 }
  0xc4   :  { %s221_s1 = spop %220 }
  0xc5   :  { %s79_s5 = smul.f32 2.0, %s221_s1 }
  0xd2   :  { %s223_s3 = spop %222 }
  0xd3   :  { %s225_s6 = spop %224 }
  0xd4   :  { %s111_s7 = ssub.f32 %s223_s3, %s225_s6  ;;  %s227_s8 = spop %226 }
  0xd5   :  { %s229_s12 = spop %228 }
  0xd6   :  { %s120_s9 = smul.f32 %s227_s8, %s111_s7 }
  0xd8   :  { %s121_s10 = ssub.f32 %s79_s5, %s120_s9 }
  0xda   :  { %s122_s11 = ssub.f32 0.0, %s121_s10 }
  0xdc   :  { %s131_s13 = smul.f32 %s229_s12, %s122_s11 }
 0x10d   :  { %v171_v62 = vpop.xlane.xlu1 %170 }
 0x10e   :  { %v172_v63 = vrot.slane %v171_v62, 4 }
 0x110   :  { %v173_v0 = vadd.f32 %v172_v63, %v171_v62 }
 0x112   :  { %v174_v1 = vrot.slane %v173_v0, 2 }
 0x114   :  { %v175_v2 = vadd.f32 %v174_v1, %v173_v0 }
 0x116   :  { %v176_v3 = vrot.slane %v175_v2, 1 }
 0x118   :  { %v177_v4 = vadd.f32 %v176_v3, %v175_v2 }
 0x11a   :  { %230 = vpush %v177_v4 }
 0x14b   :  { %s231_s14 = spop %230 }
 0x14c   :  { %v179_v5 = vstv %s231_s14 }
 0x14d   :  { %246 = vrsqrt.f32 %v179_v5  ;;  %vm187_vm5 = vcmp.eq.f32.partialorder %v179_v5, inf  ;;  %v190_v13 = vand.u32 2147483648, %v179_v5  ;;  %vm189_vm6 = vcmp.eq.f32.partialorder %v179_v5, 0.0 }
 0x153   :  { %v247_v6 = vpop.eup %246 }
 0x154   :  { %v181_v7 = vmul.f32 %v247_v6, %v179_v5 }
 0x156   :  { %v182_v8 = vmul.f32 %v247_v6, %v181_v7 }
 0x158   :  { %v183_v9 = vmul.f32 0.5, %v182_v8 }
 0x15a   :  { %v184_v10 = vsub.f32 1.5, %v183_v9 }
 0x15c   :  { %v185_v11 = vmul.f32 %v247_v6, %v184_v10 }
 0x15e   :  { %v186_v12 = vmul.f32 %v185_v11, %v179_v5 }
 0x160   :  { %v188_v14 = vsel %vm187_vm5, %v179_v5, %v186_v12 }
 0x161   :  { %v191_v15 = vsel %vm189_vm6, %v190_v13, %v188_v14 }
 0x162   :  { %232 = vpush %v191_v15 }
 0x193   :  { %s233_s21 = spop %232 }
 0x194   :  { %s193_s22 = smul.f32 %s233_s21, %s164_s17 }
 0x196   :  { %s194_s23 = sadd.f32 %s193_s22, %s131_s13 }
 0x198   :  { %196 = sst [smem:[#allocation9]] %s194_s23 }
 0x199   :  { %205 = dma.smem_to_hbm %s345_s24, 16, %s203_s20, [#allocation5]  }
 0x19a   :  { %336 = dma.done.wait [#allocation5], 16  }
 0x19b   :  { %337 = vsyncadd [#allocation5], 4294967280 }
 0x19c   :  { %210 = sfence }
 0x19d   :  { %211 = vsyncpa [#allocation4], 1 }
 0x19e   :  { %212 = vsyncpa [#allocation7], 1 }
 0x19f   :  { %213 = vsyncpa [#allocation5], 1 }

</bundles_post_ra>
